<compile_context>
chip_gen: v7x
topology: tpu7x:2x2x1
jax: 0.10.0
libtpu: 0.0.40
codegen_flags: <defaults>
</compile_context>

<pallas_src>
import functools

import jax
import jax.numpy as jnp
from jax.experimental import pallas as pl
from jax.experimental.pallas import tpu as pltpu

LANE = 128     # vreg lane width
SUBLANE = 8    # vreg sublane width


def _round_up(n, m):
    return ((n + m - 1) // m) * m


def _batch_dim_semantics():
    """v7x has 2 TensorCores per chip; plain 'parallel' does not by itself split the
    tile loop across them -- CORE_PARALLEL does.  Other generations: PARALLEL."""
    try:
        kind = jax.devices()[0].device_kind.lower()
    except Exception:
        kind = ""
    if "v7" in kind:
        return (pltpu.CORE_PARALLEL,)
    return (pltpu.PARALLEL,)


def dqn_kernel(x_ref, w1_ref, b1_ref, w2_ref, b2_ref, w3_ref, b3_ref, o_ref):
    # x_ref: (TILE_B, S) f32 streamed tile. w1/w2: bf16 (MXU), w3: f32.
    # Biases f32, added onto the f32 accumulator; ReLU fused on the VPU.
    x = x_ref[...].astype(w1_ref.dtype)                       # free VPU cast, K=S matmul
    h1 = jnp.dot(x, w1_ref[...], preferred_element_type=jnp.float32) + b1_ref[...]
    h1 = jnp.maximum(h1, 0.0).astype(w2_ref.dtype)
    h2 = jnp.dot(h1, w2_ref[...], preferred_element_type=jnp.float32) + b2_ref[...]
    h2 = jnp.maximum(h2, 0.0)                                  # stays f32 into f32 last layer
    out = jnp.dot(h2, w3_ref[...], preferred_element_type=jnp.float32) + b3_ref[...]
    o_ref[...] = out                                           # (TILE_B, A) f32, no padded lanes


def pad_params(params, compute_dtype=jnp.bfloat16):
    """Pad/cast raw (in,out)-layout weights ONCE, off the per-call critical path.

    Layers 1-2: bf16 weights, out-features zero-padded to 128 lanes (exact: padded
    units get 0 weight/bias, ReLU(0)=0, and the next layer's padded input rows are 0).
    Layer 3 stays f32.  Input-feature (K) dim of layer 1 is NOT padded -- x streams
    in unpadded.
    """
    w1, b1, w2, b2, w3, b3 = (params["w1"], params["b1"], params["w2"],
                              params["b2"], params["w3"], params["b3"])
    S, H1 = w1.shape
    H2 = w2.shape[1]
    A = w3.shape[1]
    H1p, H2p = _round_up(H1, LANE), _round_up(H2, LANE)

    def pad2(a, shape, dtype):
        out = jnp.zeros(shape, dtype)
        return out.at[: a.shape[0], : a.shape[1]].set(a.astype(dtype))

    return {
        "w1": pad2(w1, (S, H1p), compute_dtype),
        "b1": pad2(b1.reshape(1, -1), (1, H1p), jnp.float32),
        "w2": pad2(w2, (H1p, H2p), compute_dtype),
        "b2": pad2(b2.reshape(1, -1), (1, H2p), jnp.float32),
        "w3": pad2(w3, (H2p, A), jnp.float32),
        "b3": b3.reshape(1, -1).astype(jnp.float32),
    }


@functools.partial(jax.jit, static_argnames=("tile_b",))
def dqn_forward(x, padded_params, *, tile_b=1024):
    """x: (B, state_size) float32.  padded_params: output of pad_params()."""
    w1, b1, w2, b2, w3, b3 = (padded_params["w1"], padded_params["b1"],
                              padded_params["w2"], padded_params["b2"],
                              padded_params["w3"], padded_params["b3"])
    B, S = x.shape
    H1p, H2p, A = w1.shape[1], w2.shape[1], w3.shape[1]

    # Large overhead-amortizing batch tile, capped by the actual batch.
    tile_b = min(tile_b, _round_up(B, SUBLANE))
    tile_b = _round_up(tile_b, SUBLANE)
    B_pad = _round_up(B, tile_b)
    n_tiles = B_pad // tile_b

    if B_pad != B:  # only batch rows get padded (f32, no lane/dtype inflation)
        x = jnp.pad(x, ((0, B_pad - B), (0, 0)))

    resident = lambda shape: pl.BlockSpec(shape, lambda i: (0, 0))

    flops = 2 * B_pad * (S * H1p + H1p * H2p + H2p * A)
    bytes_accessed = (B_pad * S * 4 + B_pad * A * 4
                      + (w1.size + w2.size) * 2 + w3.size * 4
                      + (b1.size + b2.size + b3.size) * 4)

    out = pl.pallas_call(
        dqn_kernel,
        out_shape=jax.ShapeDtypeStruct((B_pad, A), jnp.float32),
        grid=(n_tiles,),
        in_specs=[
            pl.BlockSpec((tile_b, S), lambda i: (i, 0)),   # x tile streams, unpadded f32
            resident((S, H1p)),                            # weights/biases stay put in VMEM
            resident((1, H1p)),
            resident((H1p, H2p)),
            resident((1, H2p)),
            resident((H2p, A)),
            resident((1, A)),
        ],
        out_specs=pl.BlockSpec((tile_b, A), lambda i: (i, 0)),
        compiler_params=pltpu.CompilerParams(
            dimension_semantics=_batch_dim_semantics(),
            vmem_limit_bytes=32 * 1024 * 1024,             # headroom for large tile_b (v5e default is 16 MiB)
        ),
        cost_estimate=pl.CostEstimate(
            flops=int(flops), transcendentals=0, bytes_accessed=int(bytes_accessed)),
    )(x, w1, b1, w2, b2, w3, b3)

    return out[:B] if B_pad != B else out


def init_dqn_params(key, state_size, action_size, hidden=64):
    """Deterministic init mimicking nn.Linear default: U(-1/sqrt(fan_in), +1/sqrt(fan_in))."""
    ks = jax.random.split(key, 6)

    def lin(kw, kb, fan_in, fan_out):
        bound = 1.0 / jnp.sqrt(jnp.float32(fan_in))
        w = jax.random.uniform(kw, (fan_in, fan_out), jnp.float32, -bound, bound)
        b = jax.random.uniform(kb, (1, fan_out), jnp.float32, -bound, bound)
        return w, b

    w1, b1 = lin(ks[0], ks[1], state_size, hidden)
    w2, b2 = lin(ks[2], ks[3], hidden, hidden)
    w3, b3 = lin(ks[4], ks[5], hidden, action_size)
    return {"w1": w1, "b1": b1, "w2": w2, "b2": b2, "w3": w3, "b3": b3}


def dqn_reference(x, p, compute_dtype=jnp.bfloat16):
    """Pure-JAX reference mirroring the kernel math (bf16 layers 1-2, f32 last layer)."""
    hp = jax.lax.Precision.HIGHEST
    q = lambda a: a.astype(compute_dtype).astype(jnp.float32)
    h1 = jnp.maximum(jnp.dot(q(x), q(p["w1"]), precision=hp) + p["b1"], 0.0)
    h2 = jnp.maximum(jnp.dot(q(h1), q(p["w2"]), precision=hp) + p["b2"], 0.0)
    return jnp.dot(h2, p["w3"], precision=hp) + p["b3"]


def dqn_reference_f32(x, p):
    """Full-f32 semantics of the original PyTorch module (sanity check)."""
    hp = jax.lax.Precision.HIGHEST
    h1 = jnp.maximum(jnp.dot(x, p["w1"], precision=hp) + p["b1"], 0.0)
    h2 = jnp.maximum(jnp.dot(h1, p["w2"], precision=hp) + p["b2"], 0.0)
    return jnp.dot(h2, p["w3"], precision=hp) + p["b3"]


if __name__ == "__main__":
    key = jax.random.PRNGKey(0)
    k_param, k_x = jax.random.split(key)

    batch = 8
    state_size = 16
    action_size = 4

    raw_params = init_dqn_params(k_param, state_size, action_size, hidden=64)
    params = pad_params(raw_params)                     # one-time weight pad/cast
    x = jax.random.normal(k_x, (batch, state_size), jnp.float32)

    out = dqn_forward(x, params)
    out = jax.block_until_ready(out)
    assert out.shape == (batch, action_size)

    # Tight check vs a reference that mirrors the kernel's mixed-precision math.
    ref_q = dqn_reference(x, raw_params)
    assert jnp.allclose(out, ref_q, atol=2e-3, rtol=2e-3), "mismatch vs kernel-mirrored reference"

    # Loose check vs the full-f32 PyTorch-equivalent semantics.
    ref_f32 = dqn_reference_f32(x, raw_params)
    assert jnp.allclose(out, ref_f32, atol=5e-2, rtol=5e-2), "mismatch vs f32 reference"

    print("KERNEL_OK")
</pallas_src>

<mosaic_0001>
module attributes {stable_mosaic.version = 11 : i64} {
  func.func @dqn_kernel(%arg0: i32, %arg1: memref<8x16xf32, #tpu.memory_space<vmem>>, %arg2: memref<16x128xbf16, #tpu.memory_space<vmem>>, %arg3: memref<1x128xf32, #tpu.memory_space<vmem>>, %arg4: memref<128x128xbf16, #tpu.memory_space<vmem>>, %arg5: memref<1x128xf32, #tpu.memory_space<vmem>>, %arg6: memref<128x4xf32, #tpu.memory_space<vmem>>, %arg7: memref<1x4xf32, #tpu.memory_space<vmem>>, %arg8: memref<8x4xf32, #tpu.memory_space<vmem>>) attributes {dimension_semantics = [#tpu.dimension_semantics<parallel>], iteration_bounds = array<i64: 1>, scalar_prefetch = 0 : i64, scratch_operands = 0 : i64, tpu.core_type = #tpu.core_type<tc>, window_params = [{transform_indices = @transform_0, window_bounds = array<i64: 8, 16>}, {pipeline_mode = #tpu.pipeline_mode<synchronous>, transform_indices = @transform_1, window_bounds = array<i64: 16, 128>}, {pipeline_mode = #tpu.pipeline_mode<synchronous>, transform_indices = @transform_2, window_bounds = array<i64: 1, 128>}, {pipeline_mode = #tpu.pipeline_mode<synchronous>, transform_indices = @transform_3, window_bounds = array<i64: 128, 128>}, {pipeline_mode = #tpu.pipeline_mode<synchronous>, transform_indices = @transform_4, window_bounds = array<i64: 1, 128>}, {pipeline_mode = #tpu.pipeline_mode<synchronous>, transform_indices = @transform_5, window_bounds = array<i64: 128, 4>}, {pipeline_mode = #tpu.pipeline_mode<synchronous>, transform_indices = @transform_6, window_bounds = array<i64: 1, 4>}, {transform_indices = @transform_7, window_bounds = array<i64: 8, 4>}]} {
    %c0 = arith.constant 0 : index
    %c0_0 = arith.constant 0 : index
    %0 = vector.load %arg1[%c0, %c0_0] : memref<8x16xf32, #tpu.memory_space<vmem>>, vector<8x16xf32>
    %1 = arith.truncf %0 : vector<8x16xf32> to vector<8x16xbf16>
    %c0_1 = arith.constant 0 : index
    %c0_2 = arith.constant 0 : index
    %2 = vector.load %arg2[%c0_1, %c0_2] : memref<16x128xbf16, #tpu.memory_space<vmem>>, vector<16x128xbf16>
    %cst = arith.constant dense<0.000000e+00> : vector<8x128xf32>
    %3 = tpu.matmul %1, %2, %cst {dimension_numbers = #tpu.dot_dimension_numbers<[1], [0], [0], [1], [0, 0, 1, 1], [], []>} : vector<8x16xbf16>, vector<16x128xbf16>, vector<8x128xf32> -> vector<8x128xf32>
    %c0_3 = arith.constant 0 : index
    %c0_4 = arith.constant 0 : index
    %4 = vector.load %arg3[%c0_3, %c0_4] : memref<1x128xf32, #tpu.memory_space<vmem>>, vector<1x128xf32>
    %5 = vector.broadcast %4 : vector<1x128xf32> to vector<8x128xf32>
    %6 = arith.addf %3, %5 : vector<8x128xf32>
    %cst_5 = arith.constant 0.000000e+00 : f32
    %7 = vector.broadcast %cst_5 : f32 to vector<8x128xf32>
    %8 = arith.maximumf %6, %7 : vector<8x128xf32>
    %9 = arith.truncf %8 : vector<8x128xf32> to vector<8x128xbf16>
    %c0_6 = arith.constant 0 : index
    %c0_7 = arith.constant 0 : index
    %10 = vector.load %arg4[%c0_6, %c0_7] : memref<128x128xbf16, #tpu.memory_space<vmem>>, vector<128x128xbf16>
    %cst_8 = arith.constant dense<0.000000e+00> : vector<8x128xf32>
    %11 = tpu.matmul %9, %10, %cst_8 {dimension_numbers = #tpu.dot_dimension_numbers<[1], [0], [0], [1], [0, 0, 1, 1], [], []>} : vector<8x128xbf16>, vector<128x128xbf16>, vector<8x128xf32> -> vector<8x128xf32>
    %c0_9 = arith.constant 0 : index
    %c0_10 = arith.constant 0 : index
    %12 = vector.load %arg5[%c0_9, %c0_10] : memref<1x128xf32, #tpu.memory_space<vmem>>, vector<1x128xf32>
    %13 = vector.broadcast %12 : vector<1x128xf32> to vector<8x128xf32>
    %14 = arith.addf %11, %13 : vector<8x128xf32>
    %cst_11 = arith.constant 0.000000e+00 : f32
    %15 = vector.broadcast %cst_11 : f32 to vector<8x128xf32>
    %16 = arith.maximumf %14, %15 : vector<8x128xf32>
    %c0_12 = arith.constant 0 : index
    %c0_13 = arith.constant 0 : index
    %17 = vector.load %arg6[%c0_12, %c0_13] : memref<128x4xf32, #tpu.memory_space<vmem>>, vector<128x4xf32>
    %cst_14 = arith.constant dense<0.000000e+00> : vector<8x4xf32>
    %18 = tpu.matmul %16, %17, %cst_14 {dimension_numbers = #tpu.dot_dimension_numbers<[1], [0], [0], [1], [0, 0, 1, 1], [], []>} : vector<8x128xf32>, vector<128x4xf32>, vector<8x4xf32> -> vector<8x4xf32>
    %c0_15 = arith.constant 0 : index
    %c0_16 = arith.constant 0 : index
    %19 = vector.load %arg7[%c0_15, %c0_16] : memref<1x4xf32, #tpu.memory_space<vmem>>, vector<1x4xf32>
    %20 = vector.broadcast %19 : vector<1x4xf32> to vector<8x4xf32>
    %21 = arith.addf %18, %20 : vector<8x4xf32>
    %c0_17 = arith.constant 0 : index
    %c0_18 = arith.constant 0 : index
    %22 = vector.load %arg8[%c0_17, %c0_18] : memref<8x4xf32, #tpu.memory_space<vmem>>, vector<8x4xf32>
    tpu.vector_store %arg8[%c0_17, %c0_18], %21 {strides = array<i32>} : memref<8x4xf32, #tpu.memory_space<vmem>>, vector<8x4xf32>,
    return
  }
  func.func @transform_0(%arg0: i32) -> (i32, i32) {
    %c0_i32 = arith.constant 0 : i32
    %c0_i32_0 = arith.constant 0 : i32
    return %arg0, %c0_i32 : i32, i32
  }
  func.func @transform_1(%arg0: i32) -> (i32, i32) {
    %c0_i32 = arith.constant 0 : i32
    %c0_i32_0 = arith.constant 0 : i32
    %c0_i32_1 = arith.constant 0 : i32
    return %c0_i32, %c0_i32_0 : i32, i32
  }
  func.func @transform_2(%arg0: i32) -> (i32, i32) {
    %c0_i32 = arith.constant 0 : i32
    %c0_i32_0 = arith.constant 0 : i32
    %c0_i32_1 = arith.constant 0 : i32
    return %c0_i32, %c0_i32_0 : i32, i32
  }
  func.func @transform_3(%arg0: i32) -> (i32, i32) {
    %c0_i32 = arith.constant 0 : i32
    %c0_i32_0 = arith.constant 0 : i32
    %c0_i32_1 = arith.constant 0 : i32
    return %c0_i32, %c0_i32_0 : i32, i32
  }
  func.func @transform_4(%arg0: i32) -> (i32, i32) {
    %c0_i32 = arith.constant 0 : i32
    %c0_i32_0 = arith.constant 0 : i32
    %c0_i32_1 = arith.constant 0 : i32
    return %c0_i32, %c0_i32_0 : i32, i32
  }
  func.func @transform_5(%arg0: i32) -> (i32, i32) {
    %c0_i32 = arith.constant 0 : i32
    %c0_i32_0 = arith.constant 0 : i32
    %c0_i32_1 = arith.constant 0 : i32
    return %c0_i32, %c0_i32_0 : i32, i32
  }
  func.func @transform_6(%arg0: i32) -> (i32, i32) {
    %c0_i32 = arith.constant 0 : i32
    %c0_i32_0 = arith.constant 0 : i32
    %c0_i32_1 = arith.constant 0 : i32
    return %c0_i32, %c0_i32_0 : i32, i32
  }
  func.func @transform_7(%arg0: i32) -> (i32, i32) {
    %c0_i32 = arith.constant 0 : i32
    %c0_i32_0 = arith.constant 0 : i32
    return %arg0, %c0_i32 : i32, i32
  }
}

</mosaic_0001>

<bundles_post_ra>
// kernel: dqn_forward.1
= control target key start
LH: loop header
LB: loop body
LE: loop exit
PB: predicated region body
PF: predicated region fallthrough
CT: control target
= control target key end

     0   :  { %v439_v0 = vmov 0.0   ;;  %vm440_vm0 = vmmov 0   ;;  %vm44_vm1 = vcmask 130048   ;;  %v441_v12 = vmov 0.0|0.0   ;;  %s572_s1 = inlined_call_operand.vmem [shape: bf16[16,128], index: 1, kind: input, shape index: {}]   ;;  %s573_s0 = inlined_call_operand.vmem [shape: f32[8,16], index: 0, kind: input, shape index: {}]   ;;  %s574_s3 = inlined_call_operand.vmem [shape: bf16[128,128], index: 3, kind: input, shape index: {}]   ;;  %s575_s5 = inlined_call_operand.vmem [shape: f32[128,4], index: 5, kind: input, shape index: {}]   ;;  %s576_s2 = inlined_call_operand.vmem [shape: f32[1,128], index: 2, kind: input, shape index: {}]   ;;  %s577_s4 = inlined_call_operand.vmem [shape: f32[1,128], index: 4, kind: input, shape index: {}]   ;;  %s578_s6 = inlined_call_operand.vmem [shape: f32[1,4], index: 6, kind: input, shape index: {}]   ;;  %s579_s7 = inlined_call_operand.vmem [shape: f32[8,4], index: 7, kind: output, shape index: {}]  }
   0x1   :  { %342 = vmatprep.subr.bf16.mxu0 %v439_v0  ;;  %v430_v1 = vld [vmem:[%s572_s1] sm:$0xff]   ;;  %344 = vmatprep.mubr.msk.bf16.mxu0 %vm440_vm0, %v439_v0  ;;  %v432_v5 = vld [vmem:[%s574_s3 + $0x8] sm:$0xff]   ;;  %v433_v6 = vld [vmem:[%s574_s3 + $0x10] sm:$0xff]   ;;  %vm295_vm2 = vcmask 31744  }
   0x2   :  { %v27_v2 = vld [vmem:[%s573_s0] sm:$0xff]  ;;  %348 = vmatprep.subr.bf16.mxu1 %v439_v0  ;;  %364 = vmatprep.mubr.msk.bf16.mxu1 %vm440_vm0, %v439_v0  ;;  %v434_v7 = vld [vmem:[%s574_s3 + $0x18] sm:$0xff]   ;;  %v436_v9 = vld [vmem:[%s574_s3 + $0x28] sm:$0xff]  }
   0x3   :  { %343 = vmatpush3.bf16.msra.mxu0 %v430_v1  ;;  %v28_v3 = vpack.c.bf16 %v27_v2, %v27_v2  ;;  %v431_v4 = vld [vmem:[%s574_s3] sm:$0xff]   ;;  %v437_v10 = vld [vmem:[%s574_s3 + $0x30] sm:$0xff]   ;;  %v438_v11 = vld [vmem:[%s574_s3 + $0x38] sm:$0xff]  }
   0x4   :  { %349 = vmatpush3.bf16.msra.mxu1 %v431_v4  ;;  %v435_v8 = vld [vmem:[%s574_s3 + $0x20] sm:$0xff]   ;;  %403 = vmatprep.subr.bf16.mxu0 %v441_v12  ;;  %v203_v14 = vld [vmem:[%s575_s5 + $0x8] sm:$0xff]  ;;  %v204_v15 = vld [vmem:[%s575_s5 + $0x10] sm:$0xff] }
   0x5   :  { %350 = vmatprep.subr.bf16.mxu1 %v439_v0  ;;  %v202_v13 = vld [vmem:[%s575_s5] sm:$0xff]  ;;  %v205_v17 = vld [vmem:[%s575_s5 + $0x18] sm:$0xff]  ;;  %v207_v20 = vld [vmem:[%s575_s5 + $0x28] sm:$0xff] }
   0x6   :  { %345 = vmatmul.mubr.msk.bf16.vlgmr.msra.gmra.mrb[0].mxu0 %vm44_vm1, %v28_v3  ;;  %v404_v16 = vpack.c.bf16 %v203_v14, %v202_v13  ;;  %v407_v18 = vpack.c.bf16 %v205_v17, %v204_v15  ;;  %v206_v19 = vld [vmem:[%s575_s5 + $0x20] sm:$0xff]  ;;  %v208_v22 = vld [vmem:[%s575_s5 + $0x30] sm:$0xff]  ;;  %v209_v23 = vld [vmem:[%s575_s5 + $0x38] sm:$0xff] }
   0x7   :  { %400 = vmatprep.mubr.msk.f32.mxu0 %vm440_vm0, %v439_v0  ;;  %v410_v21 = vpack.c.bf16 %v207_v20, %v206_v19  ;;  %v413_v24 = vpack.c.bf16 %v209_v23, %v208_v22  ;;  %v210_v25 = vld [vmem:[%s575_s5 + $0x40] sm:$0xff]  ;;  %v211_v26 = vld [vmem:[%s575_s5 + $0x48] sm:$0xff]  ;;  %v212_v28 = vld [vmem:[%s575_s5 + $0x50] sm:$0xff] }
   0x8   :  { %351 = vmatpush3.bf16.msra.mxu1 %v432_v5  ;;  %405 = vmatpush3.bf16.msra.mxu0 %v404_v16  ;;  %v416_v27 = vpack.c.bf16 %v211_v26, %v210_v25  ;;  %v213_v29 = vld [vmem:[%s575_s5 + $0x58] sm:$0xff]  ;;  %v214_v31 = vld [vmem:[%s575_s5 + $0x60] sm:$0xff]  ;;  %v215_v32 = vld [vmem:[%s575_s5 + $0x68] sm:$0xff] }
   0x9   :  { %352 = vmatprep.subr.bf16.mxu1 %v439_v0  ;;  %406 = vmatprep.subr.bf16.mxu0 %v441_v12  ;;  %v419_v30 = vpack.c.bf16 %v213_v29, %v212_v28  ;;  %v422_v33 = vpack.c.bf16 %v215_v32, %v214_v31  ;;  %v301_v34 = vld [vmem:[%s576_s2] ss:$0 sm:$0xff]  ;;  %v216_v42 = vld [vmem:[%s575_s5 + $0x70] sm:$0xff]  ;;  %v217_v43 = vld [vmem:[%s575_s5 + $0x78] sm:$0xff] }
   0xa   :  { %v425_v44 = vpack.c.bf16 %v217_v43, %v216_v42  ;;  %v304_v45 = vld [vmem:[%s577_s4] ss:$0 sm:$0xff] }
   0xb   :  { %v313_v52 = vld [vmem:[%s578_s6] ss:$0 sm:$0xff] }
   0xc   :  { %353 = vmatpush3.bf16.msra.mxu1 %v433_v6  ;;  %408 = vmatpush3.bf16.msra.mxu0 %v407_v18 }
   0xd   :  { %354 = vmatprep.subr.bf16.mxu1 %v439_v0  ;;  %409 = vmatprep.subr.bf16.mxu0 %v441_v12 }
  0x10   :  { %355 = vmatpush3.bf16.msra.mxu1 %v434_v7  ;;  %411 = vmatpush3.bf16.msra.mxu0 %v410_v21 }
  0x11   :  { %356 = vmatprep.subr.bf16.mxu1 %v439_v0  ;;  %412 = vmatprep.subr.bf16.mxu0 %v441_v12 }
  0x14   :  { %357 = vmatpush3.bf16.msra.mxu1 %v435_v8  ;;  %414 = vmatpush3.bf16.msra.mxu0 %v413_v24 }
  0x15   :  { %358 = vmatprep.subr.bf16.mxu1 %v439_v0  ;;  %415 = vmatprep.subr.bf16.mxu0 %v441_v12 }
  0x18   :  { %359 = vmatpush3.bf16.msra.mxu1 %v436_v9  ;;  %417 = vmatpush3.bf16.msra.mxu0 %v416_v27 }
  0x19   :  { %360 = vmatprep.subr.bf16.mxu1 %v439_v0  ;;  %418 = vmatprep.subr.bf16.mxu0 %v441_v12 }
  0x1c   :  { %361 = vmatpush3.bf16.msra.mxu1 %v437_v10  ;;  %420 = vmatpush3.bf16.msra.mxu0 %v419_v30 }
  0x1d   :  { %362 = vmatprep.subr.bf16.mxu1 %v439_v0  ;;  %421 = vmatprep.subr.bf16.mxu0 %v441_v12 }
  0x20   :  { %363 = vmatpush3.bf16.msra.mxu1 %v438_v11  ;;  %423 = vmatpush3.bf16.msra.mxu0 %v422_v33 }
  0x21   :  { %424 = vmatprep.subr.bf16.mxu0 %v441_v12 }
  0x24   :  { %426 = vmatpush3.bf16.msra.mxu0 %v425_v44 }
  0xd9   :  { %v82_v35 = vpop.f32.mrb[0].mxu0 }
  0xda   :  { %v83_v36 = vadd.f32 %v301_v34, %v82_v35  ;;  %v346_v37 = vpop.f32.mrb[1].mxu0 }
  0xdb   :  { %v85_v38 = vpop.f32.mrb[2].mxu0 }
  0xdc   :  { %v88_v39 = vmax.f32 %v83_v36, 0.0  ;;  %v347_v40 = vpop.f32.mrb[3].mxu0 }
  0xde   :  { %v89_v41 = vpack.c.bf16 %v88_v39, %v88_v39 }
  0xe0   :  { %365 = vmatmul.mubr.bf16.vlgmr.msra.gmra.mrb[0].mxu1 %v89_v41 }
 0x1b3   :  { %v195_v46 = vpop.f32.mrb[0].mxu1 }
 0x1b4   :  { %v196_v47 = vadd.f32 %v304_v45, %v195_v46  ;;  %v366_v48 = vpop.f32.mrb[1].mxu1 }
 0x1b5   :  { %v198_v49 = vpop.f32.mrb[2].mxu1 }
 0x1b6   :  { %v201_v50 = vmax.f32 %v196_v47, 0.0  ;;  %v367_v51 = vpop.f32.mrb[3].mxu1 }
 0x1b8   :  { %401 = vmatmul.mubr.f32.vlgmr.msra.gmra.mrb[4].mxu0 %v201_v50 }
 0x28b   :  { %v291_v53 = vpop.f32.mrb[4].mxu0 }
 0x28c   :  { %v292_v54 = vadd.f32 %v313_v52, %v291_v53  ;;  %v402_v55 = vpop.f32.mrb[5].mxu0 }
 0x28e   :  { %296 = vst.msk [vmem:[%s579_s7] sm:$0xff] %vm295_vm2, %v292_v54 }

</bundles_post_ra>
